<compile_context>
chip_gen: v7x
topology: tpu7x:2x2x1
jax: 0.10.0
libtpu: 0.0.40
codegen_flags: <defaults>
</compile_context>

<pallas_src>
import jax
import jax.numpy as jnp
from jax.experimental import pallas as pl
from jax.experimental.pallas import tpu as pltpu

# ---- synthetic config (stand-in for load_models(dift_config) config) ----
PROJECTION_DIM = 32      # config['projection_dim']
NUM_LAYERS = 4           # number of diffusion feature layers stacked into feats
LAYER_CHANNELS = 16      # channels per diffusion layer
FEAT_H = FEAT_W = 16     # spatial size of extracted features
IMG_H = IMG_W = 32       # input image spatial size
IMG_C = 3


# ------------------------- Pallas kernel -------------------------
def agg_kernel(x_ref, w_ref, b_ref, o_ref):
    # x_ref: (b_blk, K, tn) bf16  channel-major feature slab, pixels on lanes
    # w_ref: (D, K)         bf16  mixing-folded projection weights, transposed (resident)
    # b_ref: (D, 1)         f32   projection bias (resident)
    # o_ref: (b_blk, D, tn) f32   lane-dense output tile
    w = w_ref[...]
    bias = b_ref[...]
    # b_blk is tiny & static (1 on 2-TC chips, B on single-TC chips) -> unrolled.
    for bi in range(x_ref.shape[0]):
        y = jnp.dot(w, x_ref[bi], preferred_element_type=jnp.float32)  # MXU (D, tn)
        o_ref[bi] = (y + bias).astype(o_ref.dtype)  # bias add is negligible at this tile count


# ------------------------- tiling / generation helpers -------------------------
def _tpu_vmem_budget_bytes():
    try:
        cap = pltpu.get_tpu_info().vmem_capacity_bytes
    except Exception:
        cap = 64 << 20          # conservative fallback (v7x physical VMEM)
    return cap // 2             # leave half of physical VMEM as compiler headroom


def _tensorcores_per_chip():
    # v7x has 2 TensorCores per chip (v4/v5p megacore also split "parallel" axes);
    # v5e / v6e have a single TensorCore.
    try:
        kind = jax.devices()[0].device_kind.lower()
    except Exception:
        return 1
    return 2 if any(t in kind for t in ("v7", "7x", "v4", "v5p")) else 1


def _choose_pixel_tile(HW, K, D, b_blk, budget):
    """Largest lane-aligned pixel tile that fits the VMEM budget, preferring no padding."""
    in_b, out_b = 2, 4                                         # bf16 inputs, f32 outputs
    resident = 2 * (D * K * in_b + D * out_b)                  # weights + bias (double-buffered)
    per_lane = 2 * b_blk * (K * in_b + D * out_b)              # double-buffered x + out tiles
    tn_max = max(128, ((budget - resident) // per_lane) // 128 * 128)
    if HW <= tn_max:
        return HW, False                                       # full extent, no pad
    t = tn_max
    while t >= 128:                                            # largest 128-multiple divisor of HW
        if HW % t == 0:
            return t, False
        t -= 128
    return tn_max, True                                        # last-resort: pad + slice


def aggregation_network_pallas(x, w_t, b_col):
    """x: (B, K, HW) bf16; w_t: (D, K) bf16; b_col: (D, 1) f32  ->  (B, D, HW) f32."""
    B, K, HW = x.shape
    D = w_t.shape[0]
    budget = _tpu_vmem_budget_bytes()
    # Generation-aware batch blocking: fold the batch into one block on single-TC chips
    # (fewer overhead-bound grid steps); keep it as a "parallel" axis on 2-TC chips.
    b_blk = 1 if (_tensorcores_per_chip() > 1 and B > 1) else B
    tn, needs_pad = _choose_pixel_tile(HW, K, D, b_blk, budget)
    HW_pad = HW
    if needs_pad:
        # TODO(synk): only reachable when HW has no 128-multiple divisor <= the VMEM-derived
        # tile; the pad + slice cost two extra HBM passes - switch to an in-kernel masked
        # tail store if this path ever becomes hot.
        HW_pad = pl.cdiv(HW, tn) * tn
        x = jnp.pad(x, ((0, 0), (0, 0), (0, HW_pad - HW)))
    grid = (B // b_blk, HW_pad // tn)
    out = pl.pallas_call(
        agg_kernel,
        out_shape=jax.ShapeDtypeStruct((B, D, HW_pad), jnp.float32),
        grid_spec=pltpu.PrefetchScalarGridSpec(
            num_scalar_prefetch=0,
            grid=grid,
            in_specs=[
                pl.BlockSpec((b_blk, K, tn), lambda bi, ti: (bi, 0, ti)),  # feature slab
                pl.BlockSpec((D, K), lambda bi, ti: (0, 0)),               # weights (resident)
                pl.BlockSpec((D, 1), lambda bi, ti: (0, 0)),               # bias (resident)
            ],
            out_specs=pl.BlockSpec((b_blk, D, tn), lambda bi, ti: (bi, 0, ti)),
        ),
        compiler_params=pltpu.CompilerParams(
            dimension_semantics=("parallel", "parallel"),
            vmem_limit_bytes=int(budget),
        ),
    )(x, w_t, b_col)
    if HW_pad != HW:
        out = out[:, :, :HW]
    return out


# ------------------------- glue (plain JAX) -------------------------
def diffusion_extractor_stub(img, extractor_proj):
    # TODO(synk): the real diffusion_extractor runs a frozen Stable Diffusion UNet with
    # feature hooks; no Pallas equivalent - replaced by a deterministic avg-pool + fixed
    # channel projection so the img -> stacked-feats data flow is preserved.
    b, c, H, W = img.shape
    x = img.reshape(b, c, FEAT_H, H // FEAT_H, FEAT_W, W // FEAT_W).mean(axis=(3, 5))
    x = jnp.einsum('bchw,ck->bkhw', x, extractor_proj)        # (b, L*C, h, w)
    return x.reshape(b, NUM_LAYERS, LAYER_CHANNELS, FEAT_H, FEAT_W)  # (b, L, C, h, w)


def init_params(key):
    k1, k2, k3, k4 = jax.random.split(key, 4)
    K = NUM_LAYERS * LAYER_CHANNELS
    return {
        "extractor_proj": jax.random.normal(k1, (IMG_C, K), jnp.float32) * 0.1,
        "agg_w": jax.random.normal(k2, (K, PROJECTION_DIM), jnp.float32) * (1.0 / K ** 0.5),
        "agg_b": jax.random.normal(k3, (PROJECTION_DIM,), jnp.float32) * 0.01,
        "mixing_logits": jax.random.normal(k4, (NUM_LAYERS,), jnp.float32),
    }


def hyperfeature_encoder_forward(img, params):
    # mirrors HyperFeatureEncoder.forward
    # NOTE: the stand-in extractor is linear, so it *could* be folded into w_t entirely
    # (review item) - intentionally not done so the structure matches the real
    # (nonlinear) UNet feature path.
    feats = diffusion_extractor_stub(img, params["extractor_proj"])   # (b, L, C, h, w)
    b = feats.shape[0]
    h, w = feats.shape[3], feats.shape[4]
    # .view((b, -1, h, w)) then flatten spatial: contiguous NCHW reshape, no transpose.
    # bf16 halves the dominant HBM read; accumulation stays f32 inside the kernel.
    x = feats.reshape(b, -1, h * w).astype(jnp.bfloat16)              # (b, K, h*w)
    # fold softmaxed per-layer mixing weights into the tiny (K, D) projection (exact)
    mix = jax.nn.softmax(params["mixing_logits"])
    mix_full = jnp.repeat(mix, LAYER_CHANNELS)                        # (K,)
    w_t = (mix_full[:, None] * params["agg_w"]).T.astype(jnp.bfloat16)  # (D, K)
    b_col = params["agg_b"][:, None]                                  # (D, 1) f32
    y = aggregation_network_pallas(x, w_t, b_col)                     # (b, D, h*w) f32
    return y.reshape(b, PROJECTION_DIM, h, w)                         # NCHW, free reshape


def reference_forward(img, params):
    # pure-f32 reference (no bf16) of the same math
    feats = diffusion_extractor_stub(img, params["extractor_proj"])
    b = feats.shape[0]
    h, w = feats.shape[3], feats.shape[4]
    x = feats.astype(jnp.float32).reshape(b, -1, h, w)
    mix = jax.nn.softmax(params["mixing_logits"])
    mix_full = jnp.repeat(mix, LAYER_CHANNELS)
    xw = x * mix_full[None, :, None, None]
    y = jnp.einsum("bkhw,kd->bdhw", xw, params["agg_w"]) + params["agg_b"][None, :, None, None]
    return y


if __name__ == "__main__":
    key = jax.random.PRNGKey(0)
    pkey, ikey = jax.random.split(key)
    params = init_params(pkey)
    img = jax.random.normal(ikey, (2, IMG_C, IMG_H, IMG_W), jnp.float32)  # NCHW input

    out = jax.block_until_ready(hyperfeature_encoder_forward(img, params))
    assert out.shape == (2, PROJECTION_DIM, FEAT_H, FEAT_W), out.shape

    ref = jax.block_until_ready(reference_forward(img, params))
    assert jnp.allclose(out, ref, rtol=2e-2, atol=2e-2), float(jnp.max(jnp.abs(out - ref)))

    print("KERNEL_OK")
</pallas_src>

<mosaic_0001>
module attributes {stable_mosaic.version = 11 : i64} {
  func.func @agg_kernel(%arg0: i32, %arg1: i32, %arg2: memref<2x64x256xbf16, #tpu.memory_space<vmem>>, %arg3: memref<32x64xbf16, #tpu.memory_space<vmem>>, %arg4: memref<32x1xf32, #tpu.memory_space<vmem>>, %arg5: memref<2x32x256xf32, #tpu.memory_space<vmem>>) attributes {dimension_semantics = [#tpu.dimension_semantics<parallel>, #tpu.dimension_semantics<parallel>], iteration_bounds = array<i64: 1, 1>, scalar_prefetch = 0 : i64, scratch_operands = 0 : i64, tpu.core_type = #tpu.core_type<tc>, window_params = [{transform_indices = @transform_0, window_bounds = array<i64: 2, 64, 256>}, {pipeline_mode = #tpu.pipeline_mode<synchronous>, transform_indices = @transform_1, window_bounds = array<i64: 32, 64>}, {pipeline_mode = #tpu.pipeline_mode<synchronous>, transform_indices = @transform_2, window_bounds = array<i64: 32, 1>}, {transform_indices = @transform_3, window_bounds = array<i64: 2, 32, 256>}]} {
    %c0 = arith.constant 0 : index
    %c0_0 = arith.constant 0 : index
    %0 = vector.load %arg3[%c0, %c0_0] : memref<32x64xbf16, #tpu.memory_space<vmem>>, vector<32x64xbf16>
    %c0_1 = arith.constant 0 : index
    %c0_2 = arith.constant 0 : index
    %1 = vector.load %arg4[%c0_1, %c0_2] : memref<32x1xf32, #tpu.memory_space<vmem>>, vector<32x1xf32>
    %c0_3 = arith.constant 0 : index
    %c0_4 = arith.constant 0 : index
    %c0_5 = arith.constant 0 : index
    %2 = vector.load %arg2[%c0_3, %c0_4, %c0_5] : memref<2x64x256xbf16, #tpu.memory_space<vmem>>, vector<1x64x256xbf16>
    %3 = vector.shape_cast %2 : vector<1x64x256xbf16> to vector<64x256xbf16>
    %cst = arith.constant dense<0.000000e+00> : vector<32x256xf32>
    %4 = tpu.matmul %0, %3, %cst {dimension_numbers = #tpu.dot_dimension_numbers<[1], [0], [0], [1], [0, 0, 1, 1], [], []>} : vector<32x64xbf16>, vector<64x256xbf16>, vector<32x256xf32> -> vector<32x256xf32>
    %5 = vector.broadcast %1 : vector<32x1xf32> to vector<32x256xf32>
    %6 = arith.addf %4, %5 : vector<32x256xf32>
    %c0_6 = arith.constant 0 : index
    %c0_7 = arith.constant 0 : index
    %c0_8 = arith.constant 0 : index
    %7 = vector.load %arg5[%c0_6, %c0_7, %c0_8] : memref<2x32x256xf32, #tpu.memory_space<vmem>>, vector<1x32x256xf32>
    %8 = vector.shape_cast %7 : vector<1x32x256xf32> to vector<32x256xf32>
    %9 = vector.shape_cast %6 : vector<32x256xf32> to vector<1x32x256xf32>
    tpu.vector_store %arg5[%c0_6, %c0_7, %c0_8], %9 {strides = array<i32>} : memref<2x32x256xf32, #tpu.memory_space<vmem>>, vector<1x32x256xf32>,
    %c1 = arith.constant 1 : index
    %c0_9 = arith.constant 0 : index
    %c0_10 = arith.constant 0 : index
    %10 = vector.load %arg2[%c1, %c0_9, %c0_10] : memref<2x64x256xbf16, #tpu.memory_space<vmem>>, vector<1x64x256xbf16>
    %11 = vector.shape_cast %10 : vector<1x64x256xbf16> to vector<64x256xbf16>
    %cst_11 = arith.constant dense<0.000000e+00> : vector<32x256xf32>
    %12 = tpu.matmul %0, %11, %cst_11 {dimension_numbers = #tpu.dot_dimension_numbers<[1], [0], [0], [1], [0, 0, 1, 1], [], []>} : vector<32x64xbf16>, vector<64x256xbf16>, vector<32x256xf32> -> vector<32x256xf32>
    %13 = vector.broadcast %1 : vector<32x1xf32> to vector<32x256xf32>
    %14 = arith.addf %12, %13 : vector<32x256xf32>
    %c1_12 = arith.constant 1 : index
    %c0_13 = arith.constant 0 : index
    %c0_14 = arith.constant 0 : index
    %15 = vector.load %arg5[%c1_12, %c0_13, %c0_14] : memref<2x32x256xf32, #tpu.memory_space<vmem>>, vector<1x32x256xf32>
    %16 = vector.shape_cast %15 : vector<1x32x256xf32> to vector<32x256xf32>
    %17 = vector.shape_cast %14 : vector<32x256xf32> to vector<1x32x256xf32>
    tpu.vector_store %arg5[%c1_12, %c0_13, %c0_14], %17 {strides = array<i32>} : memref<2x32x256xf32, #tpu.memory_space<vmem>>, vector<1x32x256xf32>,
    return
  }
  func.func @transform_0(%arg0: i32, %arg1: i32) -> (i32, i32, i32) {
    %c0_i32 = arith.constant 0 : i32
    %c0_i32_0 = arith.constant 0 : i32
    return %arg0, %c0_i32, %arg1 : i32, i32, i32
  }
  func.func @transform_1(%arg0: i32, %arg1: i32) -> (i32, i32) {
    %c0_i32 = arith.constant 0 : i32
    %c0_i32_0 = arith.constant 0 : i32
    %c0_i32_1 = arith.constant 0 : i32
    return %c0_i32, %c0_i32_0 : i32, i32
  }
  func.func @transform_2(%arg0: i32, %arg1: i32) -> (i32, i32) {
    %c0_i32 = arith.constant 0 : i32
    %c0_i32_0 = arith.constant 0 : i32
    %c0_i32_1 = arith.constant 0 : i32
    return %c0_i32, %c0_i32_0 : i32, i32
  }
  func.func @transform_3(%arg0: i32, %arg1: i32) -> (i32, i32, i32) {
    %c0_i32 = arith.constant 0 : i32
    %c0_i32_0 = arith.constant 0 : i32
    return %arg0, %c0_i32, %arg1 : i32, i32, i32
  }
}

</mosaic_0001>

<bundles_post_ra>
// kernel: tpu_custom_call.1
= control target key start
LH: loop header
LB: loop body
LE: loop exit
PB: predicated region body
PF: predicated region fallthrough
CT: control target
= control target key end

     0   :  { %8 = vsyncpa [#allocation3], 0  ;;  %s486_s0 = inlined_call_operand.hbm [shape: bf16[2,64,256], index: 0, kind: input, shape index: {}]   ;;  %s487_s1 = inlined_call_operand.vmem [shape: bf16[32,64], index: 1, kind: input, shape index: {}]   ;;  %s488_s2 = inlined_call_operand.vmem [shape: f32[32,1], index: 2, kind: input, shape index: {}]   ;;  %s489_s3 = inlined_call_operand.hbm [shape: f32[2,32,256], index: 3, kind: output, shape index: {}]  }
   0x1   :  { %9 = vsyncpa [#allocation4], 0  ;;  %s417_s12 = smov [#allocation2]   ;;  %s369_s16 = scalar_lea.hbm %s486_s0, 2048 }
   0x2   :  { %s15_s13 = sshll.u32 %s417_s12, 4  ;;  %p370_p0 = scmp.ne.s32.totalorder %s486_s0, %s369_s16  ;;  %s16_s13 = int_to_ptr.vmem [resolvable:$true] %s15_s13 }
   0x3   :  { %p373_p1 = scmp.lt.u32.totalorder %s369_s16, %s486_s0 }
   0x5   :  { %p375_p2 = pnand %p373_p1, %p370_p0 }
   0x7   :  { %378 = shalt.err (!%p375_p2)
}
   0x8   :  { %s379_s21 = scalar_lea.vmem %s16_s13, 2048  ;;  %p384_p4 = scmp.lt.s32.totalorder %s16_s13, %s16_s13 }
   0x9   :  { %p380_p3 = scmp.ne.s32.totalorder %s16_s13, %s379_s21  ;;  %p385_p5 = scmp.lt.s32.totalorder %s379_s21, %s379_s21 }
   0xb   :  { %p386_p6 = por %p385_p5, %p384_p4 }
   0xd   :  { %p387_p7 = pnand %p386_p6, %p380_p3 }
   0xf   :  { %390 = shalt.err (!%p387_p7)
}
  0x10   :  { %s418_s22 = smov 128   ;;  %s419_s23 = smov 8  }
  0x11   :  { %21 = dma.hbm_to_vmem [thread:$0]  %s486_s0, 2048, %s16_s13, [#allocation3], %s418_s22, %s418_s22, %s419_s23  }
  0x12   :  { %413 = dma.done.wait [#allocation3], 2048  }
  0x13   :  { %414 = vsyncadd [#allocation3], 4294965248  ;;  %v420_v0 = vmov 0   ;;  %v343_v1 = vld [vmem:[#allocation2 + $0x4] ss:$8 sps:$4 sm:$0xff]   ;;  %v36_v18 = vld [vmem:[%s488_s2 + $0x10] sm:$0xff] }
  0x14   :  { %155 = vmatprep.mubr.bf16.mxu0 %v420_v0  ;;  %265 = vmatprep.mubr.bf16.mxu1 %v420_v0  ;;  %v345_v2 = vld [vmem:[#allocation2 + $0x44] ss:$8 sps:$4 sm:$0xff]   ;;  %v347_v3 = vld [vmem:[#allocation2] ss:$8 sps:$4 sm:$0xff]   ;;  %v349_v5 = vld [vmem:[#allocation2 + $0x14] ss:$8 sps:$4 sm:$0xff]  }
  0x15   :  { %341 = vset.pattern.permute.xlu0 %v420_v0  ;;  %342 = vset.pattern.permute.xlu1 %v420_v0  ;;  %v348_v4 = vld [vmem:[#allocation2 + $0x40] ss:$8 sps:$4 sm:$0xff]   ;;  %v351_v6 = vld [vmem:[#allocation2 + $0x54] ss:$8 sps:$4 sm:$0xff]   ;;  %v353_v7 = vld [vmem:[#allocation2 + $0x10] ss:$8 sps:$4 sm:$0xff]  }
  0x16   :  { %123 = vmatprep.subr.bf16.mxu0 %v343_v1  ;;  %233 = vmatprep.subr.bf16.mxu1 %v345_v2  ;;  %v354_v8 = vld [vmem:[#allocation2 + $0x50] ss:$8 sps:$4 sm:$0xff]   ;;  %v355_v9 = vld [vmem:[#allocation2 + $0x24] ss:$8 sps:$4 sm:$0xff]   ;;  %v359_v11 = vld [vmem:[#allocation2 + $0x20] ss:$8 sps:$4 sm:$0xff]  }
  0x17   :  { %124 = vmatpush1.bf16.msra.mxu0 %v347_v3  ;;  %234 = vmatpush1.bf16.msra.mxu1 %v348_v4  ;;  %v357_v10 = vld [vmem:[#allocation2 + $0x64] ss:$8 sps:$4 sm:$0xff]   ;;  %v360_v12 = vld [vmem:[#allocation2 + $0x60] ss:$8 sps:$4 sm:$0xff]   ;;  %v361_v13 = vld [vmem:[#allocation2 + $0x34] ss:$8 sps:$4 sm:$0xff]  }
  0x18   :  { %125 = vmatprep.subr.bf16.mxu0 %v349_v5  ;;  %235 = vmatprep.subr.bf16.mxu1 %v351_v6  ;;  %v363_v14 = vld [vmem:[#allocation2 + $0x74] ss:$8 sps:$4 sm:$0xff]   ;;  %v365_v15 = vld [vmem:[#allocation2 + $0x30] ss:$8 sps:$4 sm:$0xff]   ;;  %v34_v17 = vld [vmem:[%s488_s2] sm:$0xff]  ;;  %vm116_vm0 = vcmask 523264  }
  0x19   :  { %v366_v16 = vld [vmem:[#allocation2 + $0x70] ss:$8 sps:$4 sm:$0xff]   ;;  %48 = vperm.xlu0 %341, %v34_v17   ;;  %58 = vperm.xlu1 %342, %v36_v18   ;;  %v367_v19 = vld [vmem:[%s487_s1] sm:$0xff]   ;;  %v35_v20 = vld [vmem:[%s488_s2 + $0x8] sm:$0xff] }
  0x1a   :  { %v37_v21 = vld [vmem:[%s488_s2 + $0x18] sm:$0xff]  ;;  %v368_v22 = vld [vmem:[%s487_s1 + $0x8] sm:$0xff]   ;;  %s421_s1 = smov [#allocation5]  }
  0x1b   :  { %126 = vmatpush1.bf16.msra.mxu0 %v353_v7  ;;  %236 = vmatpush1.bf16.msra.mxu1 %v354_v8  ;;  %s300_s2 = sshll.u32 %s421_s1, 4  ;;  %s301_s2 = int_to_ptr.vmem [resolvable:$true] %s300_s2 }
  0x1c   :  { %127 = vmatprep.subr.bf16.mxu0 %v355_v9  ;;  %237 = vmatprep.subr.bf16.mxu1 %v357_v10  ;;  %s391_s10 = scalar_lea.vmem %s301_s2, 2048  ;;  %p396_p9 = scmp.lt.s32.totalorder %s301_s2, %s301_s2 }
  0x1d   :  { %53 = vperm.xlu0 %341, %v35_v20   ;;  %63 = vperm.xlu1 %342, %v37_v21   ;;  %p392_p8 = scmp.ne.s32.totalorder %s301_s2, %s391_s10  ;;  %p397_p10 = scmp.lt.s32.totalorder %s391_s10, %s391_s10 }
  0x1f   :  { %128 = vmatpush1.bf16.msra.mxu0 %v359_v11  ;;  %238 = vmatpush1.bf16.msra.mxu1 %v360_v12  ;;  %p398_p11 = por %p397_p10, %p396_p9 }
  0x20   :  { %129 = vmatprep.subr.bf16.mxu0 %v361_v13  ;;  %239 = vmatprep.subr.bf16.mxu1 %v363_v14 }
  0x21   :  { %p399_p12 = pnand %p398_p11, %p392_p8 }
  0x23   :  { %130 = vmatpush1.bf16.msra.mxu0 %v365_v15  ;;  %240 = vmatpush1.bf16.msra.mxu1 %v366_v16 }
  0x26   :  { %322 = vmatmul.mubr.msk.bf16.vlgmr.msra.gmra.mrb[0].mxu0 %vm116_vm0, %v367_v19  ;;  %332 = vmatmul.mubr.msk.bf16.vlgmr.msra.gmra.mrb[0].mxu1 %vm116_vm0, %v367_v19 }
  0x27   :  { %165 = vmatprep.mubr.bf16.mxu0 %v420_v0  ;;  %275 = vmatprep.mubr.bf16.mxu1 %v420_v0 }
  0x2e   :  { %323 = vmatmul.mubr.msk.bf16.gmra.mrb[4].mxu0 %vm116_vm0, %v368_v22  ;;  %333 = vmatmul.mubr.msk.bf16.gmra.mrb[4].mxu1 %vm116_vm0, %v368_v22 }
  0x98   :  { %v49_v23 = vpop.permute.xlu0 %48  ;;  %v59_v25 = vpop.permute.xlu1 %58 }
  0x9c   :  { %v54_v24 = vpop.permute.xlu0 %53  ;;  %v64_v42 = vpop.permute.xlu1 %63 }
  0xf9   :  { %v157_v26 = vpop.f32.mrb[0].mxu0  ;;  %v267_v27 = vpop.f32.mrb[0].mxu1 }
  0xfa   :  { %v158_v28 = vadd.f32 %v157_v26, %v49_v23  ;;  %v268_v29 = vadd.f32 %v267_v27, %v49_v23  ;;  %v159_v30 = vpop.f32.mrb[1].mxu0  ;;  %v269_v31 = vpop.f32.mrb[1].mxu1 }
  0xfb   :  { %v160_v32 = vadd.f32 %v159_v30, %v49_v23  ;;  %v270_v33 = vadd.f32 %v269_v31, %v49_v23  ;;  %v161_v34 = vpop.f32.mrb[2].mxu0  ;;  %v271_v35 = vpop.f32.mrb[2].mxu1 }
  0xfc   :  { %176 = vst [vmem:[#allocation5] sm:$0xff] %v158_v28  ;;  %287 = vst [vmem:[#allocation5 + $0x40] sm:$0xff] %v268_v29  ;;  %v162_v36 = vadd.f32 %v161_v34, %v54_v24  ;;  %v272_v37 = vadd.f32 %v271_v35, %v54_v24  ;;  %v163_v38 = vpop.f32.mrb[3].mxu0  ;;  %v273_v39 = vpop.f32.mrb[3].mxu1 }
  0xfd   :  { %177 = vst [vmem:[#allocation5 + $0x8] sm:$0xff] %v160_v32  ;;  %288 = vst [vmem:[#allocation5 + $0x48] sm:$0xff] %v270_v33  ;;  %v164_v40 = vadd.f32 %v163_v38, %v54_v24  ;;  %v274_v41 = vadd.f32 %v273_v39, %v54_v24 }
  0xfe   :  { %178 = vst [vmem:[#allocation5 + $0x10] sm:$0xff] %v162_v36  ;;  %289 = vst [vmem:[#allocation5 + $0x50] sm:$0xff] %v272_v37 }
  0xff   :  { %179 = vst [vmem:[#allocation5 + $0x18] sm:$0xff] %v164_v40  ;;  %290 = vst [vmem:[#allocation5 + $0x58] sm:$0xff] %v274_v41 }
 0x101   :  { %v167_v43 = vpop.f32.mrb[4].mxu0  ;;  %v277_v44 = vpop.f32.mrb[4].mxu1 }
 0x102   :  { %v168_v45 = vadd.f32 %v167_v43, %v59_v25  ;;  %v278_v46 = vadd.f32 %v277_v44, %v59_v25  ;;  %v169_v47 = vpop.f32.mrb[5].mxu0  ;;  %v279_v48 = vpop.f32.mrb[5].mxu1 }
 0x103   :  { %v170_v49 = vadd.f32 %v169_v47, %v59_v25  ;;  %v280_v50 = vadd.f32 %v279_v48, %v59_v25  ;;  %v171_v51 = vpop.f32.mrb[6].mxu0  ;;  %v281_v52 = vpop.f32.mrb[6].mxu1 }
 0x104   :  { %180 = vst [vmem:[#allocation5 + $0x20] sm:$0xff] %v168_v45  ;;  %291 = vst [vmem:[#allocation5 + $0x60] sm:$0xff] %v278_v46  ;;  %v172_v53 = vadd.f32 %v171_v51, %v64_v42  ;;  %v282_v54 = vadd.f32 %v281_v52, %v64_v42  ;;  %v173_v55 = vpop.f32.mrb[7].mxu0  ;;  %v283_v56 = vpop.f32.mrb[7].mxu1 }
 0x105   :  { %181 = vst [vmem:[#allocation5 + $0x28] sm:$0xff] %v170_v49  ;;  %292 = vst [vmem:[#allocation5 + $0x68] sm:$0xff] %v280_v50  ;;  %v174_v57 = vadd.f32 %v173_v55, %v64_v42  ;;  %v284_v58 = vadd.f32 %v283_v56, %v64_v42 }
 0x106   :  { %182 = vst [vmem:[#allocation5 + $0x30] sm:$0xff] %v172_v53  ;;  %293 = vst [vmem:[#allocation5 + $0x70] sm:$0xff] %v282_v54 }
 0x107   :  { %183 = vst [vmem:[#allocation5 + $0x38] sm:$0xff] %v174_v57  ;;  %294 = vst [vmem:[#allocation5 + $0x78] sm:$0xff] %v284_v58 }
 0x108   :  { %402 = shalt.err (!%p399_p12)
}
 0x109   :  { %s403_s13 = scalar_lea.hbm %s489_s3, 2048 }
 0x10a   :  { %p404_p13 = scmp.ne.s32.totalorder %s489_s3, %s403_s13  ;;  %p407_p0 = scmp.lt.u32.totalorder %s403_s13, %s489_s3 }
 0x10c   :  { %p409_p1 = pnand %p407_p0, %p404_p13 }
 0x10e   :  { %412 = shalt.err (!%p409_p1)
}
 0x10f   :  { %s422_s18 = smov 256   ;;  %s423_s19 = smov 16  }
 0x110   :  { %306 = dma.vmem_to_hbm [thread:$0]  %s301_s2, 2048, %s489_s3, [#allocation4], %s422_s18, %s422_s18, %s423_s19  }
 0x111   :  { %415 = dma.done.wait [#allocation4], 2048  }
 0x112   :  { %416 = vsyncadd [#allocation4], 4294965248 }
 0x113   :  { %310 = vsyncpa [#allocation3], 1 }
 0x114   :  { %311 = vsyncpa [#allocation4], 1 }

</bundles_post_ra>
